<compile_context>
chip_gen: v6e
topology: v6e:2x2x1
jax: 0.10.0
libtpu: 0.0.40
codegen_flags: <defaults>
</compile_context>

<pallas_src>
import functools

import jax
import jax.numpy as jnp
from jax import lax
from jax.experimental import pallas as pl
from jax.experimental.pallas import tpu as pltpu


_MXU_DTYPE = jnp.bfloat16          # MXU operand dtype (accumulation stays f32)


@functools.lru_cache(maxsize=None)
def _vmem_limit_bytes():
  """Generation-aware scoped-VMEM limit (~80% of physical, clamped)."""
  cap = 64 * 1024 * 1024
  try:
    info = pltpu.get_tpu_info()
    cap = int(getattr(info, "vmem_capacity_bytes", cap) or cap)
  except Exception:
    pass
  return max(32 * 1024 * 1024, min(int(cap * 0.8), 110 * 1024 * 1024))


# ---------------------------------------------------------------------------
# kernels
# ---------------------------------------------------------------------------
def _embed_kernel(patch_ref, wp_ref, cls_ref, pos_ref, g_ref, b_ref, o_ref,
                  *, eps):
  """conv1-as-matmul + CLS token + positional embedding + ln_pre.

  patch_ref rows are already padded with a dummy zero row 0 per image, so the
  matmul directly produces T rows and the store is a single aligned write.
  """
  BG, T, P = patch_ref.shape
  D = wp_ref.shape[1]
  wp = wp_ref[...]
  pos = pos_ref[...]                                   # (T, D)
  g = g_ref[...]
  beta = b_ref[...]

  emb = jnp.dot(patch_ref[...].reshape(BG * T, P).astype(wp.dtype), wp,
                preferred_element_type=jnp.float32).reshape(BG, T, D)
  # Row 0 of emb is exactly zero (dummy patch row); add the class embedding
  # there via a row mask instead of an unaligned row-offset store.
  row = lax.broadcasted_iota(jnp.int32, (T, D), 0)
  cls_term = jnp.where(row == 0, jnp.broadcast_to(cls_ref[...], (T, D)), 0.0)
  full = emb + pos + cls_term                          # (BG, T, D)

  mu = jnp.mean(full, axis=-1, keepdims=True)
  var = jnp.mean((full - mu) ** 2, axis=-1, keepdims=True)
  o_ref[...] = (full - mu) * lax.rsqrt(var + eps) * g + beta


def _fused_blocks_kernel(x_ref, wqkv_ref, bqkv_ref, wo_ref, bo_ref,
                         wfc_ref, bfc_ref, wpr_ref, bpr_ref,
                         g1_ref, be1_ref, g2_ref, be2_ref,
                         o_ref, resid, *, heads, eps):
  """All residual attention blocks, grid = (batch_block, layer).

  The residual stream lives in the `resid` VMEM scratch across the layer axis;
  x is read once per batch block (l == 0), the output written once (last l).
  """
  l = pl.program_id(1)
  n_layers = pl.num_programs(1)

  @pl.when(l == 0)
  def _():
    resid[...] = x_ref[...]

  BG, T, D = x_ref.shape
  dh = D // heads
  scale = dh ** (-0.5)

  # hoist weight / parameter loads out of the batch loop
  wqkv = wqkv_ref[0]; bqkv = bqkv_ref[0]
  wo = wo_ref[0];     bo = bo_ref[0]
  wfc = wfc_ref[0];   bfc = bfc_ref[0]
  wpr = wpr_ref[0];   bpr = bpr_ref[0]
  g1 = g1_ref[0];     be1 = be1_ref[0]
  g2 = g2_ref[0];     be2 = be2_ref[0]

  def ln(v, g, b):
    mu = jnp.mean(v, axis=-1, keepdims=True)
    var = jnp.mean((v - mu) ** 2, axis=-1, keepdims=True)
    return (v - mu) * lax.rsqrt(var + eps) * g + b

  for bb in range(BG):          # small static loop over the batch block
    x = resid[bb]                                               # (T, D) f32

    # ---- x + attn(ln_1(x)); fused QKV / out-proj, heads-batched attention --
    y = ln(x, g1, be1)
    qkv = jnp.dot(y.astype(wqkv.dtype), wqkv,
                  preferred_element_type=jnp.float32) + bqkv    # (T, 3D)
    # Single relayout per tensor to a head-major layout (instead of per-head
    # 64-lane slices), then batched MXU matmuls.  Scale folded into q.
    q = (qkv[:, :D] * scale).reshape(T, heads, dh).transpose(1, 0, 2)
    k = qkv[:, D:2 * D].reshape(T, heads, dh).transpose(1, 0, 2)
    v = qkv[:, 2 * D:].reshape(T, heads, dh).transpose(1, 0, 2)  # (H, T, dh)
    s = jnp.einsum('hqd,hkd->hqk', q.astype(_MXU_DTYPE), k.astype(_MXU_DTYPE),
                   preferred_element_type=jnp.float32)           # (H, T, T)
    s = s - jnp.max(s, axis=-1, keepdims=True)
    pr = jnp.exp(s)
    pr = pr * pl.reciprocal(jnp.sum(pr, axis=-1, keepdims=True), approx=True)
    att = jnp.einsum('hqk,hkd->hqd', pr.astype(_MXU_DTYPE),
                     v.astype(_MXU_DTYPE),
                     preferred_element_type=jnp.float32)         # (H, T, dh)
    att = att.transpose(1, 0, 2).reshape(T, D)                   # concat heads
    x1 = x + jnp.dot(att.astype(wo.dtype), wo,
                     preferred_element_type=jnp.float32) + bo    # (T, D)

    # ---- x1 + mlp(ln_2(x1)); QuickGELU = h * sigmoid(1.702 h) ----
    y2 = ln(x1, g2, be2)
    hdn = jnp.dot(y2.astype(wfc.dtype), wfc,
                  preferred_element_type=jnp.float32) + bfc      # (T, 4D)
    hdn = hdn * pl.reciprocal(1.0 + jnp.exp(-1.702 * hdn), approx=True)
    resid[bb] = x1 + jnp.dot(hdn.astype(wpr.dtype), wpr,
                             preferred_element_type=jnp.float32) + bpr

  @pl.when(l == n_layers - 1)
  def _():
    o_ref[...] = resid[...]


def _head_kernel(xc_ref, g_ref, b_ref, proj_ref, o_ref, *, eps):
  """ln_post on the CLS token followed by the output projection."""
  x = xc_ref[...]                                               # (B, D)
  mu = jnp.mean(x, axis=-1, keepdims=True)
  var = jnp.mean((x - mu) ** 2, axis=-1, keepdims=True)
  y = (x - mu) * lax.rsqrt(var + eps) * g_ref[...] + b_ref[...]
  o_ref[...] = jnp.dot(y.astype(proj_ref.dtype), proj_ref[...],
                       preferred_element_type=jnp.float32)


# ---------------------------------------------------------------------------
# wrappers (pallas_call plumbing)
# ---------------------------------------------------------------------------
def _extract_patches(x, patch):
  """(B, C, H, W) -> (B, N, C*patch*patch); pure layout plumbing."""
  B, C, H, W = x.shape
  gh, gw = H // patch, W // patch
  x = x.reshape(B, C, gh, patch, gw, patch)
  x = x.transpose(0, 2, 4, 1, 3, 5)               # (B, gh, gw, C, p, p)
  return x.reshape(B, gh * gw, C * patch * patch)


def _largest_divisor(B, cap):
  bg = 1
  for d in range(1, max(cap, 1) + 1):
    if B % d == 0:
      bg = d
  return bg


def _pick_batch_block(B, T, target_rows=256):
  """Batch elems per grid step: amortize step overhead, keep >=2 steps."""
  if B <= 2:
    return 1
  cap = max(1, min(B // 2, max(1, target_rows // max(T, 1))))
  return _largest_divisor(B, cap)


def _pick_embed_block(B, max_block=8):
  if B <= 2:
    return 1
  return _largest_divisor(B, min(B // 2, max_block))


def _const_spec(shape):
  """Constant-index (resident) spec; single-buffered (never re-fetched)."""
  idx = lambda b: tuple(0 for _ in shape)
  try:
    return pl.BlockSpec(shape, idx, pipeline_mode=pl.Buffered(1))
  except (TypeError, AttributeError):   # older jax without pipeline_mode
    return pl.BlockSpec(shape, idx)


def patch_embed_ln(patches, params, *, eps=1e-5):
  B, T, P = patches.shape              # patches already padded w/ dummy row 0
  D = params["w_patch"].shape[1]
  bg = _pick_embed_block(B)
  kernel = functools.partial(_embed_kernel, eps=eps)
  return pl.pallas_call(
      kernel,
      out_shape=jax.ShapeDtypeStruct((B, T, D), jnp.float32),
      grid=(B // bg,),
      in_specs=[
          pl.BlockSpec((bg, T, P), lambda b: (b, 0, 0)),   # patches
          _const_spec((P, D)),                             # conv weight
          _const_spec((1, D)),                             # class embedding
          _const_spec((T, D)),                             # positional embedding
          _const_spec((1, D)),                             # ln_pre gamma
          _const_spec((1, D)),                             # ln_pre beta
      ],
      out_specs=pl.BlockSpec((bg, T, D), lambda b: (b, 0, 0)),
      compiler_params=pltpu.CompilerParams(
          dimension_semantics=("parallel",),
          vmem_limit_bytes=_vmem_limit_bytes()),
  )(patches, params["w_patch"], params["cls"], params["pos"],
    params["g_pre"], params["b_pre"])


def transformer_blocks(x, stacked, *, heads, batch_block=None, eps=1e-5):
  """All L residual blocks in one pallas_call, grid = (B//bg, L)."""
  B, T, D = x.shape
  L = stacked["wqkv"].shape[0]
  DL = stacked["wfc"].shape[2]
  bg = _pick_batch_block(B, T) if batch_block is None else batch_block
  while B % bg:                       # graceful fallback for non-divisors
    bg -= 1
  kernel = functools.partial(_fused_blocks_kernel, heads=heads, eps=eps)

  def wspec(r, c):
    # layer-streamed weights: default double-buffering prefetches layer l+1
    return pl.BlockSpec((1, r, c), lambda b, l: (l, 0, 0))

  return pl.pallas_call(
      kernel,
      out_shape=jax.ShapeDtypeStruct((B, T, D), jnp.float32),
      grid=(B // bg, L),
      in_specs=[
          pl.BlockSpec((bg, T, D), lambda b, l: (b, 0, 0)),   # x (1 fetch / b)
          wspec(D, 3 * D), wspec(1, 3 * D),                   # fused QKV w/b
          wspec(D, D), wspec(1, D),                           # attn out proj
          wspec(D, DL), wspec(1, DL),                         # mlp c_fc
          wspec(DL, D), wspec(1, D),                          # mlp c_proj
          wspec(1, D), wspec(1, D),                           # ln_1 gamma/beta
          wspec(1, D), wspec(1, D),                           # ln_2 gamma/beta
      ],
      out_specs=pl.BlockSpec((bg, T, D), lambda b, l: (b, 0, 0)),
      scratch_shapes=[pltpu.VMEM((bg, T, D), jnp.float32)],   # residual carry
      compiler_params=pltpu.CompilerParams(
          dimension_semantics=("parallel", "arbitrary"),
          vmem_limit_bytes=_vmem_limit_bytes()),
  )(x, stacked["wqkv"], stacked["bqkv"], stacked["wo"], stacked["bo"],
    stacked["wfc"], stacked["bfc"], stacked["wpr"], stacked["bpr"],
    stacked["g1"], stacked["be1"], stacked["g2"], stacked["be2"])


def cls_head(x_cls, params, *, eps=1e-5):
  B, D = x_cls.shape
  O = params["proj"].shape[1]
  kernel = functools.partial(_head_kernel, eps=eps)
  return pl.pallas_call(
      kernel,
      out_shape=jax.ShapeDtypeStruct((B, O), jnp.float32),
      grid=(1,),
      in_specs=[
          pl.BlockSpec((B, D), lambda i: (0, 0)),
          pl.BlockSpec((1, D), lambda i: (0, 0)),
          pl.BlockSpec((1, D), lambda i: (0, 0)),
          pl.BlockSpec((D, O), lambda i: (0, 0)),
      ],
      out_specs=pl.BlockSpec((B, O), lambda i: (0, 0)),
      compiler_params=pltpu.CompilerParams(
          dimension_semantics=("arbitrary",),
          vmem_limit_bytes=_vmem_limit_bytes()),
  )(x_cls, params["g_post"], params["b_post"], params["proj"])


def vision_transformer(x, params, *, heads, patch_size):
  patches = _extract_patches(x, patch_size)            # (B, N, 3*p*p)
  B, N, P = patches.shape
  # dummy leading row -> the embed matmul directly yields T = N+1 rows and the
  # kernel's store is sublane-aligned (row 0 gets the CLS embedding in-kernel)
  patches = jnp.concatenate(
      [jnp.zeros((B, 1, P), patches.dtype), patches], axis=1)
  h = patch_embed_ln(patches, params)                  # conv1 + cls + pos + ln_pre
  stacked = {k: jnp.stack([blk[k] for blk in params["blocks"]])
             for k in params["blocks"][0]}             # (L, ...) weight stacks
  h = transformer_blocks(h, stacked, heads=heads)      # all L blocks, 1 call
  return cls_head(h[:, 0, :], params)                  # ln_post(cls) @ proj


# ---------------------------------------------------------------------------
# parameter construction (lane-dense (in, out) layouts, bf16 matmul weights)
# ---------------------------------------------------------------------------
def _init_block(key, d, heads):
  ks = jax.random.split(key, 12)
  f32, bf16 = jnp.float32, jnp.bfloat16
  dl = 4 * d
  s = d ** (-0.5)
  return dict(
      wqkv=(jax.random.normal(ks[0], (d, 3 * d), f32) * s).astype(bf16),
      bqkv=0.02 * jax.random.normal(ks[1], (1, 3 * d), f32),
      wo=(jax.random.normal(ks[2], (d, d), f32) * s).astype(bf16),
      bo=0.02 * jax.random.normal(ks[3], (1, d), f32),
      wfc=(jax.random.normal(ks[4], (d, dl), f32) * s).astype(bf16),
      bfc=0.02 * jax.random.normal(ks[5], (1, dl), f32),
      wpr=(jax.random.normal(ks[6], (dl, d), f32) * (dl ** (-0.5))).astype(bf16),
      bpr=0.02 * jax.random.normal(ks[7], (1, d), f32),
      g1=1.0 + 0.1 * jax.random.normal(ks[8], (1, d), f32),
      be1=0.05 * jax.random.normal(ks[9], (1, d), f32),
      g2=1.0 + 0.1 * jax.random.normal(ks[10], (1, d), f32),
      be2=0.05 * jax.random.normal(ks[11], (1, d), f32),
  )


def init_vit_params(key, *, input_resolution, patch_size, width, layers, heads,
                    output_dim):
  assert width % heads == 0
  C = 3
  P = C * patch_size * patch_size
  T = (input_resolution // patch_size) ** 2 + 1
  f32, bf16 = jnp.float32, jnp.bfloat16
  s = width ** (-0.5)
  keys = jax.random.split(key, 8 + layers)
  w_conv = jax.random.normal(keys[0], (width, C, patch_size, patch_size), f32)
  w_conv = w_conv * (P ** (-0.5))
  return dict(
      w_patch=w_conv.reshape(width, P).T.astype(bf16),   # (P, width) lane-dense
      cls=s * jax.random.normal(keys[1], (1, width), f32),
      pos=s * jax.random.normal(keys[2], (T, width), f32),
      g_pre=1.0 + 0.1 * jax.random.normal(keys[3], (1, width), f32),
      b_pre=0.05 * jax.random.normal(keys[4], (1, width), f32),
      g_post=1.0 + 0.1 * jax.random.normal(keys[5], (1, width), f32),
      b_post=0.05 * jax.random.normal(keys[6], (1, width), f32),
      proj=(s * jax.random.normal(keys[7], (width, output_dim), f32)).astype(bf16),
      blocks=[_init_block(k, width, heads) for k in keys[8:]],
  )


# ---------------------------------------------------------------------------
# pure-JAX f32 reference (PyTorch semantics) for a correctness spot check
# ---------------------------------------------------------------------------
def _ref_ln(v, g, b, eps=1e-5):
  mu = v.mean(-1, keepdims=True)
  var = ((v - mu) ** 2).mean(-1, keepdims=True)
  return (v - mu) / jnp.sqrt(var + eps) * g + b


def _ref_block(x, p, heads, eps=1e-5):
  f32 = jnp.float32
  hi = lax.Precision.HIGHEST
  B, T, D = x.shape
  dh = D // heads
  y = _ref_ln(x, p["g1"], p["be1"], eps)
  qkv = jnp.dot(y, p["wqkv"].astype(f32), precision=hi) + p["bqkv"]
  q = qkv[..., :D].reshape(B, T, heads, dh)
  k = qkv[..., D:2 * D].reshape(B, T, heads, dh)
  v = qkv[..., 2 * D:].reshape(B, T, heads, dh)
  s = jnp.einsum("bihd,bjhd->bhij", q, k, precision=hi) * dh ** (-0.5)
  a = jax.nn.softmax(s, axis=-1)
  o = jnp.einsum("bhij,bjhd->bihd", a, v, precision=hi).reshape(B, T, D)
  x = x + jnp.dot(o, p["wo"].astype(f32), precision=hi) + p["bo"]
  y2 = _ref_ln(x, p["g2"], p["be2"], eps)
  h = jnp.dot(y2, p["wfc"].astype(f32), precision=hi) + p["bfc"]
  h = h * jax.nn.sigmoid(1.702 * h)
  return x + jnp.dot(h, p["wpr"].astype(f32), precision=hi) + p["bpr"]


def _ref_vit(x, params, *, heads, patch_size, eps=1e-5):
  f32 = jnp.float32
  hi = lax.Precision.HIGHEST
  P, D = params["w_patch"].shape
  B, C = x.shape[0], x.shape[1]
  p = patch_size
  w_conv = params["w_patch"].astype(f32).T.reshape(D, C, p, p)
  feat = lax.conv_general_dilated(
      x, w_conv, (p, p), "VALID",
      dimension_numbers=("NCHW", "OIHW", "NCHW"), precision=hi)
  tok = feat.reshape(B, D, -1).transpose(0, 2, 1)                 # (B, N, D)
  cls = jnp.broadcast_to(params["cls"][None], (B, 1, D))
  h = jnp.concatenate([cls, tok], axis=1) + params["pos"][None]
  h = _ref_ln(h, params["g_pre"], params["b_pre"], eps)
  for blk in params["blocks"]:
    h = _ref_block(h, blk, heads, eps)
  y = _ref_ln(h[:, 0, :], params["g_post"], params["b_post"], eps)
  return jnp.dot(y, params["proj"].astype(f32), precision=hi)


# ---------------------------------------------------------------------------
if __name__ == "__main__":
  INPUT_RES, PATCH, WIDTH, LAYERS, HEADS, OUT_DIM = 16, 4, 32, 2, 4, 16
  B = 2

  root = jax.random.PRNGKey(0)
  kx, kp = jax.random.split(root)
  x = jax.random.normal(kx, (B, 3, INPUT_RES, INPUT_RES), jnp.float32)
  params = init_vit_params(
      kp, input_resolution=INPUT_RES, patch_size=PATCH, width=WIDTH,
      layers=LAYERS, heads=HEADS, output_dim=OUT_DIM)

  out = vision_transformer(x, params, heads=HEADS, patch_size=PATCH)
  out = jax.block_until_ready(out)

  ref = _ref_vit(x, params, heads=HEADS, patch_size=PATCH)
  assert out.shape == (B, OUT_DIM)
  err = float(jnp.max(jnp.abs(out - ref)))
  # bf16 MXU operands + approx reciprocals vs the f32 reference => loosened tol
  assert jnp.allclose(out, ref, atol=5e-2, rtol=5e-2), (
      f"mismatch vs reference (max abs err {err:.4g})")
  print("KERNEL_OK")
</pallas_src>

<mosaic_0001>
module attributes {stable_mosaic.version = 11 : i64} {
  func.func @_embed_kernel(%arg0: i32, %arg1: memref<1x17x48xf32, #tpu.memory_space<vmem>>, %arg2: memref<48x32xbf16, #tpu.memory_space<vmem>>, %arg3: memref<1x32xf32, #tpu.memory_space<vmem>>, %arg4: memref<17x32xf32, #tpu.memory_space<vmem>>, %arg5: memref<1x32xf32, #tpu.memory_space<vmem>>, %arg6: memref<1x32xf32, #tpu.memory_space<vmem>>, %arg7: memref<1x17x32xf32, #tpu.memory_space<vmem>>) attributes {dimension_semantics = [#tpu.dimension_semantics<parallel>], iteration_bounds = array<i64: 2>, scalar_prefetch = 0 : i64, scratch_operands = 0 : i64, tpu.core_type = #tpu.core_type<tc>, window_params = [{transform_indices = @transform_0, window_bounds = array<i64: 1, 17, 48>}, {pipeline_mode = #tpu.pipeline_mode<synchronous>, transform_indices = @transform_1, window_bounds = array<i64: 48, 32>}, {pipeline_mode = #tpu.pipeline_mode<synchronous>, transform_indices = @transform_2, window_bounds = array<i64: 1, 32>}, {pipeline_mode = #tpu.pipeline_mode<synchronous>, transform_indices = @transform_3, window_bounds = array<i64: 17, 32>}, {pipeline_mode = #tpu.pipeline_mode<synchronous>, transform_indices = @transform_4, window_bounds = array<i64: 1, 32>}, {pipeline_mode = #tpu.pipeline_mode<synchronous>, transform_indices = @transform_5, window_bounds = array<i64: 1, 32>}, {transform_indices = @transform_6, window_bounds = array<i64: 1, 17, 32>}]} {
    %c0 = arith.constant 0 : index
    %c0_0 = arith.constant 0 : index
    %0 = vector.load %arg2[%c0, %c0_0] : memref<48x32xbf16, #tpu.memory_space<vmem>>, vector<48x32xbf16>
    %c0_1 = arith.constant 0 : index
    %c0_2 = arith.constant 0 : index
    %1 = vector.load %arg4[%c0_1, %c0_2] : memref<17x32xf32, #tpu.memory_space<vmem>>, vector<17x32xf32>
    %c0_3 = arith.constant 0 : index
    %c0_4 = arith.constant 0 : index
    %2 = vector.load %arg5[%c0_3, %c0_4] : memref<1x32xf32, #tpu.memory_space<vmem>>, vector<1x32xf32>
    %c0_5 = arith.constant 0 : index
    %c0_6 = arith.constant 0 : index
    %3 = vector.load %arg6[%c0_5, %c0_6] : memref<1x32xf32, #tpu.memory_space<vmem>>, vector<1x32xf32>
    %c0_7 = arith.constant 0 : index
    %c0_8 = arith.constant 0 : index
    %c0_9 = arith.constant 0 : index
    %4 = vector.load %arg1[%c0_7, %c0_8, %c0_9] : memref<1x17x48xf32, #tpu.memory_space<vmem>>, vector<1x17x48xf32>
    %5 = vector.shape_cast %4 : vector<1x17x48xf32> to vector<17x48xf32>
    %6 = arith.truncf %5 : vector<17x48xf32> to vector<17x48xbf16>
    %cst = arith.constant dense<0.000000e+00> : vector<17x32xf32>
    %7 = tpu.matmul %6, %0, %cst {dimension_numbers = #tpu.dot_dimension_numbers<[1], [0], [0], [1], [0, 0, 1, 1], [], []>} : vector<17x48xbf16>, vector<48x32xbf16>, vector<17x32xf32> -> vector<17x32xf32>
    %8 = vector.shape_cast %7 : vector<17x32xf32> to vector<1x17x32xf32>
    %9 = tpu.iota {dimensions = array<i32: 0>} : vector<17x32xi32>
    %c0_i32 = arith.constant 0 : i32
    %10 = vector.broadcast %c0_i32 : i32 to vector<17x32xi32>
    %11 = arith.cmpi eq, %9, %10 : vector<17x32xi32>
    %c0_10 = arith.constant 0 : index
    %c0_11 = arith.constant 0 : index
    %12 = vector.load %arg3[%c0_10, %c0_11] : memref<1x32xf32, #tpu.memory_space<vmem>>, vector<1x32xf32>
    %13 = vector.shape_cast %12 : vector<1x32xf32> to vector<1x32xf32>
    %14 = vector.broadcast %13 : vector<1x32xf32> to vector<17x32xf32>
    %cst_12 = arith.constant 0.000000e+00 : f32
    %15 = vector.broadcast %cst_12 : f32 to vector<17x32xf32>
    %16 = arith.select %11, %14, %15 : vector<17x32xi1>, vector<17x32xf32>
    %17 = vector.shape_cast %1 : vector<17x32xf32> to vector<1x17x32xf32>
    %18 = arith.addf %8, %17 : vector<1x17x32xf32>
    %19 = vector.shape_cast %16 : vector<17x32xf32> to vector<1x17x32xf32>
    %20 = arith.addf %18, %19 : vector<1x17x32xf32>
    %cst_13 = arith.constant dense<0.000000e+00> : vector<1x17xf32>
    %21 = vector.multi_reduction <add>, %20, %cst_13 [2] : vector<1x17x32xf32> to vector<1x17xf32>
    %22 = vector.shape_cast %21 : vector<1x17xf32> to vector<1x17x1xf32>
    %cst_14 = arith.constant 3.200000e+01 : f32
    %23 = vector.broadcast %cst_14 : f32 to vector<1x17x1xf32>
    %24 = arith.divf %22, %23 : vector<1x17x1xf32>
    %25 = vector.broadcast %24 : vector<1x17x1xf32> to vector<1x17x32xf32>
    %26 = arith.subf %20, %25 : vector<1x17x32xf32>
    %27 = arith.mulf %26, %26 : vector<1x17x32xf32>
    %cst_15 = arith.constant dense<0.000000e+00> : vector<1x17xf32>
    %28 = vector.multi_reduction <add>, %27, %cst_15 [2] : vector<1x17x32xf32> to vector<1x17xf32>
    %29 = vector.shape_cast %28 : vector<1x17xf32> to vector<1x17x1xf32>
    %cst_16 = arith.constant 3.200000e+01 : f32
    %30 = vector.broadcast %cst_16 : f32 to vector<1x17x1xf32>
    %31 = arith.divf %29, %30 : vector<1x17x1xf32>
    %32 = vector.broadcast %24 : vector<1x17x1xf32> to vector<1x17x32xf32>
    %33 = arith.subf %20, %32 : vector<1x17x32xf32>
    %cst_17 = arith.constant 9.99999974E-6 : f32
    %34 = vector.broadcast %cst_17 : f32 to vector<1x17x1xf32>
    %35 = arith.addf %31, %34 : vector<1x17x1xf32>
    %36 = math.rsqrt %35 : vector<1x17x1xf32>
    %37 = vector.broadcast %36 : vector<1x17x1xf32> to vector<1x17x32xf32>
    %38 = arith.mulf %33, %37 : vector<1x17x32xf32>
    %39 = vector.shape_cast %2 : vector<1x32xf32> to vector<1x1x32xf32>
    %40 = vector.broadcast %39 : vector<1x1x32xf32> to vector<1x17x32xf32>
    %41 = arith.mulf %38, %40 : vector<1x17x32xf32>
    %42 = vector.shape_cast %3 : vector<1x32xf32> to vector<1x1x32xf32>
    %43 = vector.broadcast %42 : vector<1x1x32xf32> to vector<1x17x32xf32>
    %44 = arith.addf %41, %43 : vector<1x17x32xf32>
    %c0_18 = arith.constant 0 : index
    %c0_19 = arith.constant 0 : index
    %c0_20 = arith.constant 0 : index
    %45 = vector.load %arg7[%c0_18, %c0_19, %c0_20] : memref<1x17x32xf32, #tpu.memory_space<vmem>>, vector<1x17x32xf32>
    tpu.vector_store %arg7[%c0_18, %c0_19, %c0_20], %44 {strides = array<i32>} : memref<1x17x32xf32, #tpu.memory_space<vmem>>, vector<1x17x32xf32>,
    return
  }
  func.func @transform_0(%arg0: i32) -> (i32, i32, i32) {
    %c0_i32 = arith.constant 0 : i32
    %c0_i32_0 = arith.constant 0 : i32
    %c0_i32_1 = arith.constant 0 : i32
    return %arg0, %c0_i32, %c0_i32_0 : i32, i32, i32
  }
  func.func @transform_1(%arg0: i32) -> (i32, i32) {
    %c0_i32 = arith.constant 0 : i32
    %c0_i32_0 = arith.constant 0 : i32
    %c0_i32_1 = arith.constant 0 : i32
    return %c0_i32, %c0_i32_0 : i32, i32
  }
  func.func @transform_2(%arg0: i32) -> (i32, i32) {
    %c0_i32 = arith.constant 0 : i32
    %c0_i32_0 = arith.constant 0 : i32
    %c0_i32_1 = arith.constant 0 : i32
    return %c0_i32, %c0_i32_0 : i32, i32
  }
  func.func @transform_3(%arg0: i32) -> (i32, i32) {
    %c0_i32 = arith.constant 0 : i32
    %c0_i32_0 = arith.constant 0 : i32
    %c0_i32_1 = arith.constant 0 : i32
    return %c0_i32, %c0_i32_0 : i32, i32
  }
  func.func @transform_4(%arg0: i32) -> (i32, i32) {
    %c0_i32 = arith.constant 0 : i32
    %c0_i32_0 = arith.constant 0 : i32
    %c0_i32_1 = arith.constant 0 : i32
    return %c0_i32, %c0_i32_0 : i32, i32
  }
  func.func @transform_5(%arg0: i32) -> (i32, i32) {
    %c0_i32 = arith.constant 0 : i32
    %c0_i32_0 = arith.constant 0 : i32
    %c0_i32_1 = arith.constant 0 : i32
    return %c0_i32, %c0_i32_0 : i32, i32
  }
  func.func @transform_6(%arg0: i32) -> (i32, i32, i32) {
    %c0_i32 = arith.constant 0 : i32
    %c0_i32_0 = arith.constant 0 : i32
    %c0_i32_1 = arith.constant 0 : i32
    return %arg0, %c0_i32, %c0_i32_0 : i32, i32, i32
  }
}

</mosaic_0001>

<bundles_post_ra>
// kernel: tpu_custom_call.1
= control target key start
LH: loop header
LB: loop body
LE: loop exit
PB: predicated region body
PF: predicated region fallthrough
CT: control target
= control target key end

     0   :  { %s576_s21 = smov 0   ;;  %s636_s0 = inlined_call_operand.vmem [shape: f32[2,17,48], index: 0, kind: input, shape index: {}]   ;;  %s637_s1 = inlined_call_operand.vmem [shape: bf16[48,32], index: 1, kind: input, shape index: {}]   ;;  %s638_s2 = inlined_call_operand.vmem [shape: f32[1,32], index: 2, kind: input, shape index: {}]   ;;  %s639_s3 = inlined_call_operand.vmem [shape: f32[17,32], index: 3, kind: input, shape index: {}]   ;;  %s640_s4 = inlined_call_operand.vmem [shape: f32[1,32], index: 4, kind: input, shape index: {}]   ;;  %s641_s5 = inlined_call_operand.vmem [shape: f32[1,32], index: 5, kind: input, shape index: {}]   ;;  %s642_s6 = inlined_call_operand.vmem [shape: f32[2,17,32], index: 6, kind: output, shape index: {}]  }
   0x1 LB: > { %s483_s22 = sadd.s32 4294967295, %s539_s21   ;;  %p487_p0 = scmp.ge.s32.totalorder %s539_s21, 1  ;;  %s539_s21 = sphi %s576_s21, %s16_s21  }
   0x2   : > { %p212_p1 = scmp.lt.s32.totalorder %s539_s21, 3 }
   0x4   : > { %p213_p2 = pnand %p487_p0, %p212_p1 }
   0x5   : > { %p242_p3 = scmp.lt.s32.totalorder (!%p213_p2), %s483_s22, 1 }
   0x6   : > { %216 = sbr.rel (%p213_p2) target bundleno = 537 (0x219), region = 44 }
   0xb   : > { %v524_v0 = vld [vmem:[%s637_s1 + $0x10] sm:$0xff]   ;;  %v525_v1 = vld [vmem:[%s637_s1 + $0x8] sm:$0xff]   ;;  %s644_s22 = smov (!%p242_p3, %s483_s22), 1  ;;  %v526_v2 = vld [vmem:[%s637_s1] sm:$0xff]   ;;  %vm287_vm0 = vcmask 392192   ;;  %v342_v8 = vlaneseq  ;;  %vm372_vm2 = vcmask 253952  }
   0xc   : > { %505 = vmatprep.subr.bf16.mxu0 %v524_v0  ;;  %s515_s29 = smul.u32 24, %s644_s22  ;;  %v261_v10 = vld [vmem:[%s639_s3 + $0x10] sm:$0x1]  ;;  %v495_v11 = vld [vmem:[%s638_s2] ss:$0 sm:$0xff]  ;;  %v260_v20 = vld [vmem:[%s639_s3 + $0x8] sm:$0xff] }
   0xd   : > { %506 = vmatpush3.bf16.msra.mxu0 %v524_v0  ;;  %v343_v9 = vshrl.u32 %v342_v8, 7  ;;  %v259_v13 = vld [vmem:[%s639_s3] sm:$0xff]  ;;  %vm365_vm3 = vcmask 261120  }
   0xe   : > { %507 = vmatprep.subr.bf16.mxu0 %v525_v1  ;;  %s246_s8 = scalar_lea.vmem %s636_s0, %s515_s29  ;;  %v496_v51 = vld [vmem:[%s640_s4] ss:$0 sm:$0xff]  ;;  %s251_s25 = scalar_lea.vmem %s642_s6, %s515_s29 }
   0xf   : > { %v264_v3 = vld [vmem:[%s246_s8] sm:$0xff]  ;;  %v265_v4 = vld [vmem:[%s246_s8 + $0x8] sm:$0xff]  ;;  %v266_v5 = vld [vmem:[%s246_s8 + $0x10] sm:$0x1]  ;;  %vm346_vm1 = vcmp.eq.s32.totalorder %v343_v9, 0 }
  0x10   : > { %v267_v6 = vpack.c.bf16 %v265_v4, %v264_v3  ;;  %v268_v7 = vpack.c.bf16 %v266_v5, %v266_v5  ;;  %v356_v16 = vsel %vm346_vm1, %v495_v11, 0.0  ;;  %v497_v53 = vld [vmem:[%s641_s5] ss:$0 sm:$0xff] }
  0x11   : > { %508 = vmatpush3.bf16.msra.mxu0 %v525_v1 }
  0x12   : > { %509 = vmatprep.subr.bf16.mxu0 %v526_v2  ;;  %511 = vmatprep.mubr.msk.bf16.mxu0 %vm287_vm0, %v267_v6 }
  0x15   : > { %510 = vmatpush3.bf16.msra.mxu0 %v526_v2 }
  0x18   : > { %512 = vmatmul.mubr.msk.bf16.vlgmr.msra.gmra.mxu0 %vm287_vm0, %v268_v7 }
  0xd8   : > { %v513_v12 = vpop.f32.mrf.mxu0 }
  0xd9   : > { %v361_v14 = vadd.f32 %v513_v12, %v261_v10 }
  0xda   : > { %v328_v15 = vpop.f32.mrf.mxu0 }
  0xdb   : > { %v359_v17 = vadd.f32 %v328_v15, %v259_v13  ;;  %v373_v18 = vsel %vm372_vm2, %v361_v14, 0.0 }
  0xdc   : > { %374 = vadd.xlane.f32.xlu1 %v373_v18  ;;  %v514_v19 = vpop.f32.mrf.mxu0 }
  0xdd   : > { %v362_v21 = vadd.f32 %v359_v17, %v356_v16 }
  0xde   : > { %v331_v22 = vpop.f32.mrf.mxu0 }
  0xdf   : > { %v360_v23 = vadd.f32 %v331_v22, %v260_v20  ;;  %v366_v24 = vsel %vm365_vm3, %v362_v21, 0.0 }
  0xe0   : > { %367 = vadd.xlane.f32.xlu0 %v366_v24 }
  0xe1   : > { %v369_v25 = vsel %vm365_vm3, %v360_v23, 0.0 }
  0xe4   : > { %370 = vadd.xlane.f32.xlu0 %v369_v25 }
 0x165   : > { %v375_v26 = vpop.xlane.xlu1 %374 }
 0x166   : > { %v379_v27 = vmul.f32 0.03125, %v375_v26 }
 0x168   : > { %v382_v30 = vsub.f32 %v361_v14, %v379_v27 }
 0x169   : > { %v368_v28 = vpop.xlane.xlu0 %367 }
 0x16a   : > { %v377_v29 = vmul.f32 0.03125, %v368_v28  ;;  %v385_v37 = vmul.f32 %v382_v30, %v382_v30 }
 0x16c   : > { %v380_v31 = vsub.f32 %v362_v21, %v377_v29  ;;  %v392_v39 = vsel %vm372_vm2, %v385_v37, 0.0 }
 0x16d   : > { %v371_v32 = vpop.xlane.xlu0 %370 }
 0x16e   : > { %v378_v33 = vmul.f32 0.03125, %v371_v32  ;;  %v383_v34 = vmul.f32 %v380_v31, %v380_v31 }
 0x170   : > { %v381_v35 = vsub.f32 %v360_v23, %v378_v33  ;;  %v386_v36 = vsel %vm365_vm3, %v383_v34, 0.0 }
 0x171   : > { %387 = vadd.xlane.f32.xlu1 %v386_v36 }
 0x172   : > { %v384_v38 = vmul.f32 %v381_v35, %v381_v35 }
 0x174   : > { %v389_v40 = vsel %vm365_vm3, %v384_v38, 0.0 }
 0x175   : > { %393 = vadd.xlane.f32.xlu1 %v392_v39  ;;  %390 = vadd.xlane.f32.xlu0 %v389_v40 }
 0x1fa   : > { %v388_v41 = vpop.xlane.xlu1 %387 }
 0x1fb   : > { %v395_v42 = vmul.f32 0.03125, %v388_v41 }
 0x1fd   : > { %v398_v43 = vadd.f32 1e-05, %v395_v42 }
 0x1fe   : > { %v394_v44 = vpop.xlane.xlu1 %393  ;;  %v391_v45 = vpop.xlane.xlu0 %390 }
 0x1ff   : > { %527 = vrsqrt.f32 %v398_v43  ;;  %v397_v46 = vmul.f32 0.03125, %v394_v44  ;;  %v396_v47 = vmul.f32 0.03125, %v391_v45 }
 0x201   : > { %v400_v48 = vadd.f32 1e-05, %v397_v46  ;;  %v399_v49 = vadd.f32 1e-05, %v396_v47 }
 0x203   : > { %529 = vrsqrt.f32 %v400_v48 }
 0x204   : > { %531 = vrsqrt.f32 %v399_v49 }
 0x20c   : > { %v528_v50 = vpop.eup %527 }
 0x20d   : > { %v404_v52 = vmul.f32 %v528_v50, %v380_v31 }
 0x20f   : > { %v413_v54 = vmul.f32 %v496_v51, %v404_v52 }
 0x210   : > { %v530_v55 = vpop.eup %529 }
 0x211   : > { %v532_v56 = vpop.eup %531  ;;  %v422_v57 = vadd.f32 %v497_v53, %v413_v54  ;;  %v406_v58 = vmul.f32 %v530_v55, %v382_v30 }
 0x212   : > { %v405_v59 = vmul.f32 %v532_v56, %v381_v35 }
 0x213   : > { %425 = vst.msk [vmem:[%s251_s25] sm:$0xff] %vm365_vm3, %v422_v57  ;;  %v415_v60 = vmul.f32 %v496_v51, %v406_v58 }
 0x214   : > { %v414_v61 = vmul.f32 %v496_v51, %v405_v59 }
 0x215   : > { %v424_v62 = vadd.f32 %v497_v53, %v415_v60 }
 0x216   : > { %v423_v63 = vadd.f32 %v497_v53, %v414_v61 }
 0x217   : > { %427 = vst.msk [vmem:[%s251_s25 + $0x10] sm:$0x1] %vm372_vm2, %v424_v62 }
 0x218   : > { %426 = vst.msk [vmem:[%s251_s25 + $0x8] sm:$0xff] %vm365_vm3, %v423_v63 }
 0x219 PF: > { %s16_s21 = sadd.s32 1, %s539_s21  }
 0x21a   : > { %p13_p4 = scmp.ge.s32.totalorder %s16_s21, 4  }
 0x21c   :  { %15 = sbr.rel (!%p13_p4) target bundleno = 1 (0x1), region = 74 }

</bundles_post_ra>
